<compile_context>
chip_gen: v6e
topology: v6e:2x2x1
jax: 0.10.0
libtpu: 0.0.40
codegen_flags: <defaults>
</compile_context>

<pallas_src>
import math

import numpy as np
import jax
import jax.numpy as jnp
from jax.experimental import pallas as pl
from jax.experimental.pallas import tpu as pltpu


# ----------------------------------------------------------------------------
# Pallas kernel: tiled matmul  out[m, n] = sum_k img[m, k] * sel[k, n]
# ----------------------------------------------------------------------------
def _rotate_matmul_kernel(img_ref, sel_ref, out_ref, acc_ref):
    @pl.when(pl.program_id(2) == 0)
    def _():
        acc_ref[...] = jnp.zeros_like(acc_ref)

    acc_ref[...] += jnp.dot(
        img_ref[...],
        sel_ref[...].astype(jnp.float32),  # bf16 one-hot -> f32 (0/1 exact)
        preferred_element_type=jnp.float32,
    )

    @pl.when(pl.program_id(2) == pl.num_programs(2) - 1)
    def _():
        out_ref[...] = acc_ref[...].astype(out_ref.dtype)


# ----------------------------------------------------------------------------
# Host-side geometry (float64, mirrors PIL.Image.rotate exactly)
# ----------------------------------------------------------------------------
def _pil_inverse_affine(angle_deg, H, W):
    """PIL's inverse affine coefficients for center rotation (expand=False)."""
    angle = float(angle_deg) % 360.0
    cx, cy = W / 2.0, H / 2.0
    rad = -math.radians(angle)
    a = round(math.cos(rad), 15)
    b = round(math.sin(rad), 15)
    d = round(-math.sin(rad), 15)
    e = round(math.cos(rad), 15)
    c = a * (-cx) + b * (-cy) + cx
    f = d * (-cx) + e * (-cy) + cy
    return a, b, c, d, e, f


def _src_index_map(angle_deg, H, W):
    """Flat int32 source index per output pixel (-1 => out-of-bounds => fill 0)."""
    a, b, c, d, e, f = _pil_inverse_affine(angle_deg, H, W)
    oy, ox = np.meshgrid(
        np.arange(H, dtype=np.float64) + 0.5,
        np.arange(W, dtype=np.float64) + 0.5,
        indexing="ij",
    )
    sx = np.floor(a * ox + b * oy + c).astype(np.int64)
    sy = np.floor(d * ox + e * oy + f).astype(np.int64)
    inb = (sx >= 0) & (sx < W) & (sy >= 0) & (sy < H)
    src = np.where(inb, sy * W + sx, -1).astype(np.int32)
    return src.reshape(-1)  # (H*W,)


def _onehot_sel(src, HW):
    """Host-built one-hot selection matrix sel[k, p] = 1 iff src[p] == k (bf16)."""
    sel = np.zeros((HW, HW), dtype=np.float32)
    cols = np.arange(HW)
    valid = src >= 0
    sel[src[valid], cols[valid]] = 1.0
    return jnp.asarray(sel, dtype=jnp.bfloat16)


def _pick_tile(dim, pref, align):
    """Largest multiple of `align` that divides `dim` and is <= pref, else `dim`."""
    if dim <= pref:
        return dim
    best = None
    t = align
    while t <= pref:
        if dim % t == 0:
            best = t
        t += align
    return best if best is not None else dim


# ----------------------------------------------------------------------------
# Pallas-backed rotation of an NCHW batch by a fixed (host-known) angle
# ----------------------------------------------------------------------------
def _rotate_pallas(img, angle):
    B, C, H, W = img.shape
    BC, HW = B * C, H * W

    src = _src_index_map(angle, H, W)          # host, float64 geometry
    sel = _onehot_sel(src, HW)                 # (HW, HW) bf16
    img_flat = jnp.asarray(img, jnp.float32).reshape(BC, HW)

    tm = BC if BC <= 128 else _pick_tile(BC, 128, 8)
    tn = _pick_tile(HW, 512, 128)
    tk = _pick_tile(HW, 512, 128)
    grid = (BC // tm, HW // tn, HW // tk)

    cost = pl.CostEstimate(
        flops=int(2 * BC * HW * HW),
        transcendentals=0,
        bytes_accessed=int(img_flat.size * 4 + sel.size * 2 + BC * HW * 4),
    )

    out_flat = pl.pallas_call(
        _rotate_matmul_kernel,
        out_shape=jax.ShapeDtypeStruct((BC, HW), jnp.float32),
        grid_spec=pltpu.PrefetchScalarGridSpec(
            num_scalar_prefetch=0,
            grid=grid,
            in_specs=[
                pl.BlockSpec((tm, tk), lambda m, n, k: (m, k)),  # img tile
                pl.BlockSpec((tk, tn), lambda m, n, k: (k, n)),  # one-hot tile
            ],
            out_specs=pl.BlockSpec((tm, tn), lambda m, n, k: (m, n)),
            scratch_shapes=[pltpu.VMEM((tm, tn), jnp.float32)],
        ),
        compiler_params=pltpu.CompilerParams(
            dimension_semantics=("parallel", "parallel", "arbitrary"),
        ),
        cost_estimate=cost,
    )(img_flat, sel)

    return out_flat.reshape(B, C, H, W).astype(img.dtype)


# ----------------------------------------------------------------------------
# Module-equivalent wrapper (host-side randomness, matches the PyTorch forward)
# ----------------------------------------------------------------------------
def rotate_single_cell(img, p=0.8, rng=None):
    """JAX/Pallas equivalent of Rotate_single_cell.forward on an NCHW batch."""
    if rng is None:
        rng = np.random
    if rng.rand() < p:
        angle = int(rng.randint(0, 360))
    else:
        angle = 0
    if angle % 360 == 0:          # identity fast path: never launch the kernel
        return img
    return _rotate_pallas(img, angle)


if __name__ == "__main__":
    key = jax.random.PRNGKey(0)
    img = jax.random.uniform(key, (2, 4, 16, 16), dtype=jnp.float32)
    B, C, H, W = img.shape
    BC, HW = B * C, H * W

    # 1) (1 - p) branch / angle == 0: identity fast path, no kernel call.
    out_id = rotate_single_cell(img, p=0.0, rng=np.random.RandomState(0))
    assert out_id.shape == img.shape and jnp.allclose(out_id, img)

    # 2) Forced rotation so the Pallas kernel definitely runs; check against a
    #    host-side nearest-neighbour gather reference.
    angle = 37
    out = _rotate_pallas(img, angle)
    jax.block_until_ready(out)
    assert out.shape == img.shape and out.dtype == img.dtype
    src = _src_index_map(angle, H, W)
    img_np = np.asarray(img).reshape(BC, HW)
    ref = np.where(src[None, :] >= 0, img_np[:, np.clip(src, 0, None)], 0.0)
    np.testing.assert_allclose(np.asarray(out).reshape(BC, HW), ref, atol=2e-2)

    # 3) Module-equivalent stochastic path (seeded numpy RNG on the host).
    out2 = rotate_single_cell(img, p=0.8, rng=np.random.RandomState(0))
    jax.block_until_ready(out2)
    assert out2.shape == img.shape and out2.dtype == img.dtype

    print("KERNEL_OK")
</pallas_src>

<mosaic_0001>
module attributes {stable_mosaic.version = 11 : i64} {
  func.func @_rotate_matmul_kernel(%arg0: i32, %arg1: i32, %arg2: i32, %arg3: memref<8x256xf32, #tpu.memory_space<vmem>>, %arg4: memref<256x256xbf16, #tpu.memory_space<vmem>>, %arg5: memref<8x256xf32, #tpu.memory_space<vmem>>, %arg6: memref<8x256xf32, #tpu.memory_space<vmem>>) attributes {dimension_semantics = [#tpu.dimension_semantics<parallel>, #tpu.dimension_semantics<parallel>, #tpu.dimension_semantics<arbitrary>], iteration_bounds = array<i64: 1, 1, 1>, scalar_prefetch = 0 : i64, scratch_operands = 1 : i64, tpu.core_type = #tpu.core_type<tc>, window_params = [{transform_indices = @transform_0, window_bounds = array<i64: 8, 256>}, {transform_indices = @transform_1, window_bounds = array<i64: 256, 256>}, {transform_indices = @transform_2, window_bounds = array<i64: 8, 256>}]} {
    %c0_i32 = arith.constant 0 : i32
    %0 = arith.cmpi eq, %arg2, %c0_i32 : i32
    %1 = arith.extui %0 : i1 to i32
    %c0_i32_0 = arith.constant 0 : i32
    %2 = arith.cmpi ne, %1, %c0_i32_0 : i32
    scf.if %2 {
      %cst_10 = arith.constant 0.000000e+00 : f32
      %13 = vector.broadcast %cst_10 : f32 to vector<8x256xf32>
      %c0_11 = arith.constant 0 : index
      %c0_12 = arith.constant 0 : index
      %14 = vector.load %arg6[%c0_11, %c0_12] : memref<8x256xf32, #tpu.memory_space<vmem>>, vector<8x256xf32>
      tpu.vector_store %arg6[%c0_11, %c0_12], %13 {strides = array<i32>} : memref<8x256xf32, #tpu.memory_space<vmem>>, vector<8x256xf32>,
    } else {
    }
    %c0 = arith.constant 0 : index
    %c0_1 = arith.constant 0 : index
    %3 = vector.load %arg6[%c0, %c0_1] : memref<8x256xf32, #tpu.memory_space<vmem>>, vector<8x256xf32>
    %c0_2 = arith.constant 0 : index
    %c0_3 = arith.constant 0 : index
    %4 = vector.load %arg3[%c0_2, %c0_3] : memref<8x256xf32, #tpu.memory_space<vmem>>, vector<8x256xf32>
    %c0_4 = arith.constant 0 : index
    %c0_5 = arith.constant 0 : index
    %5 = vector.load %arg4[%c0_4, %c0_5] : memref<256x256xbf16, #tpu.memory_space<vmem>>, vector<256x256xbf16>
    %6 = arith.extf %5 : vector<256x256xbf16> to vector<256x256xf32>
    %cst = arith.constant dense<0.000000e+00> : vector<8x256xf32>
    %7 = tpu.matmul %4, %6, %cst {dimension_numbers = #tpu.dot_dimension_numbers<[1], [0], [0], [1], [0, 0, 1, 1], [], []>} : vector<8x256xf32>, vector<256x256xf32>, vector<8x256xf32> -> vector<8x256xf32>
    %8 = arith.addf %3, %7 : vector<8x256xf32>
    %c0_6 = arith.constant 0 : index
    %c0_7 = arith.constant 0 : index
    %9 = vector.load %arg6[%c0_6, %c0_7] : memref<8x256xf32, #tpu.memory_space<vmem>>, vector<8x256xf32>
    tpu.vector_store %arg6[%c0_6, %c0_7], %8 {strides = array<i32>} : memref<8x256xf32, #tpu.memory_space<vmem>>, vector<8x256xf32>,
    %c0_i32_8 = arith.constant 0 : i32
    %10 = arith.cmpi eq, %arg2, %c0_i32_8 : i32
    %11 = arith.extui %10 : i1 to i32
    %c0_i32_9 = arith.constant 0 : i32
    %12 = arith.cmpi ne, %11, %c0_i32_9 : i32
    scf.if %12 {
      %c0_10 = arith.constant 0 : index
      %c0_11 = arith.constant 0 : index
      %13 = vector.load %arg6[%c0_10, %c0_11] : memref<8x256xf32, #tpu.memory_space<vmem>>, vector<8x256xf32>
      %c0_12 = arith.constant 0 : index
      %c0_13 = arith.constant 0 : index
      %14 = vector.load %arg5[%c0_12, %c0_13] : memref<8x256xf32, #tpu.memory_space<vmem>>, vector<8x256xf32>
      tpu.vector_store %arg5[%c0_12, %c0_13], %13 {strides = array<i32>} : memref<8x256xf32, #tpu.memory_space<vmem>>, vector<8x256xf32>,
    } else {
    }
    return
  }
  func.func @transform_0(%arg0: i32, %arg1: i32, %arg2: i32) -> (i32, i32) {
    %c0_i32 = arith.constant 0 : i32
    return %arg0, %arg2 : i32, i32
  }
  func.func @transform_1(%arg0: i32, %arg1: i32, %arg2: i32) -> (i32, i32) {
    %c0_i32 = arith.constant 0 : i32
    return %arg2, %arg1 : i32, i32
  }
  func.func @transform_2(%arg0: i32, %arg1: i32, %arg2: i32) -> (i32, i32) {
    %c0_i32 = arith.constant 0 : i32
    return %arg0, %arg1 : i32, i32
  }
}

</mosaic_0001>

<bundles_post_ra>
// kernel: tpu_custom_call.1
= control target key start
LH: loop header
LB: loop body
LE: loop exit
PB: predicated region body
PF: predicated region fallthrough
CT: control target
= control target key end

     0   :  { %7 = vsyncpa [#allocation4], 0  ;;  %s342_s0 = inlined_call_operand.hbm [shape: f32[8,256], index: 0, kind: input, shape index: {}]   ;;  %s343_s1 = inlined_call_operand.hbm [shape: bf16[256,256], index: 1, kind: input, shape index: {}]   ;;  %s344_s2 = inlined_call_operand.hbm [shape: f32[8,256], index: 2, kind: output, shape index: {}]  }
   0x1   :  { %8 = vsyncpa [#allocation7], 0 }
   0x2   :  { %9 = vsyncpa [#allocation5], 0  ;;  %s313_s9 = smov [#allocation3]   ;;  %s314_s11 = smov [#allocation6]  }
   0x3   :  { %s16_s10 = sshll.u32 %s313_s9, 4  ;;  %s25_s12 = sshll.u32 %s314_s11, 4  ;;  %s17_s10 = int_to_ptr.vmem [resolvable:$true] %s16_s10  ;;  %s26_s12 = int_to_ptr.vmem [resolvable:$true] %s25_s12 }
   0x4   :  { %s255_s13 = scalar_lea.vmem %s17_s10, 256  ;;  %p260_p1 = scmp.lt.s32.totalorder %s17_s10, %s17_s10 }
   0x5   :  { %p256_p0 = scmp.ne.s32.totalorder %s17_s10, %s255_s13  ;;  %p261_p2 = scmp.lt.s32.totalorder %s255_s13, %s255_s13 }
   0x7   :  { %p262_p3 = por %p261_p2, %p260_p1 }
   0x9   :  { %p263_p4 = pnand %p262_p3, %p256_p0 }
   0xb   :  { %266 = shalt.err (!%p263_p4)
}
   0xc   :  { %19 = dma.hbm_to_vmem [thread:$0]  %s342_s0, 256, %s17_s10, [#allocation4]  }
   0xd   :  { %s275_s16 = scalar_lea.vmem %s26_s12, 4096  ;;  %p280_p6 = scmp.lt.s32.totalorder %s26_s12, %s26_s12 }
   0xe   :  { %p276_p5 = scmp.ne.s32.totalorder %s26_s12, %s275_s16  ;;  %p281_p7 = scmp.lt.s32.totalorder %s275_s16, %s275_s16 }
  0x10   :  { %p282_p8 = por %p281_p7, %p280_p6 }
  0x12   :  { %p283_p9 = pnand %p282_p8, %p276_p5 }
  0x14   :  { %286 = shalt.err (!%p283_p9)
}
  0x15   :  { %s315_s17 = smov 128   ;;  %s316_s18 = smov 8  }
  0x16   :  { %31 = dma.hbm_to_vmem [thread:$0]  %s343_s1, 4096, %s26_s12, [#allocation7], %s315_s17, %s315_s17, %s316_s18  }
  0x17   :  { %307 = dma.done.wait [#allocation4], 256  }
  0x18   :  { %308 = vsyncadd [#allocation4], 4294967040 }
  0x19   :  { %309 = dma.done.wait [#allocation7], 4096  }
  0x1a   :  { %310 = vsyncadd [#allocation7], 4294963200  ;;  %v63_v0 = vld [vmem:[#allocation6 + $0x78] sm:$0xff]  ;;  %v62_v1 = vld [vmem:[#allocation6 + $0x70] sm:$0xff]  ;;  %s317_s0 = smov [#allocation8]  }
  0x1b   :  { %v61_v2 = vld [vmem:[#allocation6 + $0x68] sm:$0xff]  ;;  %v111_v3 = vunpack.c.h.bf16 %v63_v0  ;;  %v110_v4 = vunpack.c.l.bf16 %v63_v0  ;;  %v109_v5 = vunpack.c.h.bf16 %v62_v1  ;;  %v108_v6 = vunpack.c.l.bf16 %v62_v1  ;;  %v60_v7 = vld [vmem:[#allocation6 + $0x60] sm:$0xff]  ;;  %v59_v10 = vld [vmem:[#allocation6 + $0x58] sm:$0xff]  ;;  %s232_s1 = sshll.u32 %s317_s0, 4  ;;  %s233_s1 = int_to_ptr.vmem [resolvable:$true] %s232_s1 }
  0x1c   :  { %v107_v8 = vunpack.c.h.bf16 %v61_v2  ;;  %v106_v9 = vunpack.c.l.bf16 %v61_v2  ;;  %v105_v11 = vunpack.c.h.bf16 %v60_v7  ;;  %v104_v12 = vunpack.c.l.bf16 %v60_v7  ;;  %v58_v13 = vld [vmem:[#allocation6 + $0x50] sm:$0xff]  ;;  %v57_v16 = vld [vmem:[#allocation6 + $0x48] sm:$0xff]  ;;  %v56_v19 = vld [vmem:[#allocation6 + $0x40] sm:$0xff]  ;;  %s287_s21 = scalar_lea.vmem %s233_s1, 256  ;;  %p292_p11 = scmp.lt.s32.totalorder %s233_s1, %s233_s1 }
  0x1d   :  { %144 = vmatprep.subr.mxu0 %v111_v3  ;;  %v103_v14 = vunpack.c.h.bf16 %v59_v10  ;;  %v102_v15 = vunpack.c.l.bf16 %v59_v10  ;;  %v101_v17 = vunpack.c.h.bf16 %v58_v13  ;;  %v100_v18 = vunpack.c.l.bf16 %v58_v13  ;;  %v47_v20 = vld [vmem:[#allocation3 + $0x8] sm:$0xff]  ;;  %v54_v26 = vld [vmem:[#allocation6 + $0x30] sm:$0xff]  ;;  %v53_v29 = vld [vmem:[#allocation6 + $0x28] sm:$0xff]  ;;  %p288_p10 = scmp.ne.s32.totalorder %s233_s1, %s287_s21  ;;  %p293_p12 = scmp.lt.s32.totalorder %s287_s21, %s287_s21 }
  0x1e   :  { %145 = vmatpush1.msra.mxu0 %v110_v4  ;;  %v99_v21 = vunpack.c.h.bf16 %v57_v16  ;;  %208 = vmatprep.mubr.f32.mxu0 %v47_v20  ;;  %v98_v22 = vunpack.c.l.bf16 %v57_v16  ;;  %v55_v23 = vld [vmem:[#allocation6 + $0x38] sm:$0xff]  ;;  %v97_v24 = vunpack.c.h.bf16 %v56_v19  ;;  %v96_v25 = vunpack.c.l.bf16 %v56_v19  ;;  %v52_v32 = vld [vmem:[#allocation6 + $0x20] sm:$0xff]  ;;  %v50_v38 = vld [vmem:[#allocation6 + $0x10] sm:$0xff] }
  0x1f   :  { %146 = vmatprep.subr.mxu0 %v109_v5  ;;  %v95_v27 = vunpack.c.h.bf16 %v55_v23  ;;  %v94_v28 = vunpack.c.l.bf16 %v55_v23  ;;  %v93_v30 = vunpack.c.h.bf16 %v54_v26  ;;  %v92_v31 = vunpack.c.l.bf16 %v54_v26  ;;  %v51_v35 = vld [vmem:[#allocation6 + $0x18] sm:$0xff]  ;;  %v49_v41 = vld [vmem:[#allocation6 + $0x8] sm:$0xff]  ;;  %v48_v44 = vld [vmem:[#allocation6] sm:$0xff]  ;;  %p294_p13 = por %p293_p12, %p292_p11 }
  0x20   :  { %147 = vmatpush1.msra.mxu0 %v108_v6  ;;  %v91_v33 = vunpack.c.h.bf16 %v53_v29  ;;  %v90_v34 = vunpack.c.l.bf16 %v53_v29  ;;  %v89_v36 = vunpack.c.h.bf16 %v52_v32  ;;  %v88_v37 = vunpack.c.l.bf16 %v52_v32  ;;  %v79_v47 = vld [vmem:[#allocation6 + $0xf8] sm:$0xff]  ;;  %v78_v50 = vld [vmem:[#allocation6 + $0xf0] sm:$0xff]  ;;  %v77_v53 = vld [vmem:[#allocation6 + $0xe8] sm:$0xff] }
  0x21   :  { %148 = vmatprep.subr.mxu0 %v107_v8  ;;  %v87_v39 = vunpack.c.h.bf16 %v51_v35  ;;  %v86_v40 = vunpack.c.l.bf16 %v51_v35  ;;  %v85_v42 = vunpack.c.h.bf16 %v50_v38  ;;  %v84_v43 = vunpack.c.l.bf16 %v50_v38  ;;  %v76_v56 = vld [vmem:[#allocation6 + $0xe0] sm:$0xff]  ;;  %v75_v59 = vld [vmem:[#allocation6 + $0xd8] sm:$0xff]  ;;  %v74_v62 = vld [vmem:[#allocation6 + $0xd0] sm:$0xff]  ;;  %p295_p0 = pnand %p294_p13, %p288_p10 }
  0x22   :  { %149 = vmatpush1.msra.mxu0 %v106_v9  ;;  %v83_v45 = vunpack.c.h.bf16 %v49_v41  ;;  %v82_v46 = vunpack.c.l.bf16 %v49_v41  ;;  %v81_v48 = vunpack.c.h.bf16 %v48_v44  ;;  %v80_v49 = vunpack.c.l.bf16 %v48_v44  ;;  %v73_v1 = vld [vmem:[#allocation6 + $0xc8] sm:$0xff]  ;;  %v72_v4 = vld [vmem:[#allocation6 + $0xc0] sm:$0xff]  ;;  %v71_v7 = vld [vmem:[#allocation6 + $0xb8] sm:$0xff] }
  0x23   :  { %150 = vmatprep.subr.mxu0 %v105_v11  ;;  %v143_v51 = vunpack.c.h.bf16 %v79_v47  ;;  %v142_v52 = vunpack.c.l.bf16 %v79_v47  ;;  %v141_v54 = vunpack.c.h.bf16 %v78_v50  ;;  %v140_v55 = vunpack.c.l.bf16 %v78_v50  ;;  %v70_v10 = vld [vmem:[#allocation6 + $0xb0] sm:$0xff]  ;;  %v69_v13 = vld [vmem:[#allocation6 + $0xa8] sm:$0xff]  ;;  %v68_v16 = vld [vmem:[#allocation6 + $0xa0] sm:$0xff] }
  0x24   :  { %151 = vmatpush1.msra.mxu0 %v104_v12  ;;  %v139_v57 = vunpack.c.h.bf16 %v77_v53  ;;  %v138_v58 = vunpack.c.l.bf16 %v77_v53  ;;  %v137_v60 = vunpack.c.h.bf16 %v76_v56  ;;  %v136_v61 = vunpack.c.l.bf16 %v76_v56  ;;  %v67_v19 = vld [vmem:[#allocation6 + $0x98] sm:$0xff] }
  0x25   :  { %152 = vmatprep.subr.mxu0 %v103_v14  ;;  %v135_v63 = vunpack.c.h.bf16 %v75_v59  ;;  %v134_v0 = vunpack.c.l.bf16 %v75_v59  ;;  %v133_v2 = vunpack.c.h.bf16 %v74_v62  ;;  %v132_v3 = vunpack.c.l.bf16 %v74_v62 }
  0x26   :  { %153 = vmatpush1.msra.mxu0 %v102_v15  ;;  %v131_v5 = vunpack.c.h.bf16 %v73_v1  ;;  %v130_v6 = vunpack.c.l.bf16 %v73_v1  ;;  %v129_v8 = vunpack.c.h.bf16 %v72_v4  ;;  %v128_v9 = vunpack.c.l.bf16 %v72_v4 }
  0x27   :  { %154 = vmatprep.subr.mxu0 %v101_v17  ;;  %v127_v11 = vunpack.c.h.bf16 %v71_v7  ;;  %v126_v12 = vunpack.c.l.bf16 %v71_v7  ;;  %v125_v14 = vunpack.c.h.bf16 %v70_v10  ;;  %v124_v15 = vunpack.c.l.bf16 %v70_v10 }
  0x28   :  { %155 = vmatpush1.msra.mxu0 %v100_v18  ;;  %v123_v17 = vunpack.c.h.bf16 %v69_v13  ;;  %v122_v18 = vunpack.c.l.bf16 %v69_v13  ;;  %v121_v20 = vunpack.c.h.bf16 %v68_v16  ;;  %v119_v23 = vunpack.c.h.bf16 %v67_v19 }
  0x29   :  { %156 = vmatprep.subr.mxu0 %v99_v21  ;;  %v120_v21 = vunpack.c.l.bf16 %v68_v16 }
  0x2a   :  { %157 = vmatpush1.msra.mxu0 %v98_v22  ;;  %v66_v22 = vld [vmem:[#allocation6 + $0x90] sm:$0xff] }
  0x2b   :  { %158 = vmatprep.subr.mxu0 %v97_v24  ;;  %v118_v24 = vunpack.c.l.bf16 %v67_v19  ;;  %v117_v26 = vunpack.c.h.bf16 %v66_v22 }
  0x2c   :  { %159 = vmatpush1.msra.mxu0 %v96_v25  ;;  %v65_v25 = vld [vmem:[#allocation6 + $0x88] sm:$0xff] }
  0x2d   :  { %160 = vmatprep.subr.mxu0 %v95_v27  ;;  %v116_v27 = vunpack.c.l.bf16 %v66_v22  ;;  %v115_v29 = vunpack.c.h.bf16 %v65_v25 }
  0x2e   :  { %161 = vmatpush1.msra.mxu0 %v94_v28  ;;  %v64_v28 = vld [vmem:[#allocation6 + $0x80] sm:$0xff] }
  0x2f   :  { %162 = vmatprep.subr.mxu0 %v93_v30  ;;  %v114_v30 = vunpack.c.l.bf16 %v65_v25  ;;  %v112_v32 = vunpack.c.l.bf16 %v64_v28 }
  0x30   :  { %163 = vmatpush1.msra.mxu0 %v92_v31  ;;  %v113_v31 = vunpack.c.h.bf16 %v64_v28 }
  0x31   :  { %164 = vmatprep.subr.mxu0 %v91_v33  ;;  %v46_v33 = vld [vmem:[#allocation3] sm:$0xff] }
  0x32   :  { %165 = vmatpush1.msra.mxu0 %v90_v34 }
  0x33   :  { %166 = vmatprep.subr.mxu0 %v89_v36 }
  0x34   :  { %167 = vmatpush1.msra.mxu0 %v88_v37 }
  0x35   :  { %168 = vmatprep.subr.mxu0 %v87_v39 }
  0x36   :  { %169 = vmatpush1.msra.mxu0 %v86_v40 }
  0x37   :  { %170 = vmatprep.subr.mxu0 %v85_v42 }
  0x38   :  { %171 = vmatpush1.msra.mxu0 %v84_v43 }
  0x39   :  { %172 = vmatprep.subr.mxu0 %v83_v45 }
  0x3a   :  { %173 = vmatpush1.msra.mxu0 %v82_v46 }
  0x3b   :  { %174 = vmatprep.subr.mxu0 %v81_v48 }
  0x3c   :  { %175 = vmatpush1.msra.mxu0 %v80_v49 }
  0x3d   :  { %176 = vmatprep.subr.mxu0 %v143_v51 }
  0x3e   :  { %177 = vmatpush2.msra.mxu0 %v142_v52 }
  0x3f   :  { %178 = vmatprep.subr.mxu0 %v141_v54 }
  0x40   :  { %179 = vmatpush2.msra.mxu0 %v140_v55 }
  0x41   :  { %180 = vmatprep.subr.mxu0 %v139_v57 }
  0x42   :  { %181 = vmatpush2.msra.mxu0 %v138_v58 }
  0x43   :  { %182 = vmatprep.subr.mxu0 %v137_v60 }
  0x44   :  { %183 = vmatpush2.msra.mxu0 %v136_v61 }
  0x45   :  { %184 = vmatprep.subr.mxu0 %v135_v63 }
  0x46   :  { %185 = vmatpush2.msra.mxu0 %v134_v0 }
  0x47   :  { %186 = vmatprep.subr.mxu0 %v133_v2 }
  0x48   :  { %187 = vmatpush2.msra.mxu0 %v132_v3 }
  0x49   :  { %188 = vmatprep.subr.mxu0 %v131_v5 }
  0x4a   :  { %189 = vmatpush2.msra.mxu0 %v130_v6 }
  0x4b   :  { %190 = vmatprep.subr.mxu0 %v129_v8 }
  0x4c   :  { %191 = vmatpush2.msra.mxu0 %v128_v9 }
  0x4d   :  { %192 = vmatprep.subr.mxu0 %v127_v11 }
  0x4e   :  { %193 = vmatpush2.msra.mxu0 %v126_v12 }
  0x4f   :  { %194 = vmatprep.subr.mxu0 %v125_v14 }
  0x50   :  { %195 = vmatpush2.msra.mxu0 %v124_v15 }
  0x51   :  { %196 = vmatprep.subr.mxu0 %v123_v17 }
  0x52   :  { %197 = vmatpush2.msra.mxu0 %v122_v18 }
  0x53   :  { %198 = vmatprep.subr.mxu0 %v121_v20 }
  0x54   :  { %199 = vmatpush2.msra.mxu0 %v120_v21 }
  0x55   :  { %200 = vmatprep.subr.mxu0 %v119_v23 }
  0x56   :  { %201 = vmatpush2.msra.mxu0 %v118_v24 }
  0x57   :  { %202 = vmatprep.subr.mxu0 %v117_v26 }
  0x58   :  { %203 = vmatpush2.msra.mxu0 %v116_v27 }
  0x59   :  { %204 = vmatprep.subr.mxu0 %v115_v29 }
  0x5a   :  { %205 = vmatpush2.msra.mxu0 %v114_v30 }
  0x5b   :  { %206 = vmatprep.subr.mxu0 %v113_v31 }
  0x5c   :  { %207 = vmatpush2.msra.mxu0 %v112_v32 }
  0x5d   :  { %209 = vmatmul.mubr.f32.vlgmr.msra.gmra.mxu0 %v46_v33 }
 0x11d   :  { %v210_v34 = vpop.f32.mrf.mxu0 }
 0x11e   :  { %224 = vst [vmem:[#allocation8] sm:$0xff] %v210_v34 }
 0x11f   :  { %v212_v35 = vpop.f32.mrf.mxu0 }
 0x120   :  { %225 = vst [vmem:[#allocation8 + $0x8] sm:$0xff] %v212_v35 }
 0x121   :  { %298 = shalt.err (!%p295_p0)
}
 0x122   :  { %235 = dma.vmem_to_hbm [thread:$0]  %s233_s1, 256, %s344_s2, [#allocation5]  }
 0x123   :  { %311 = dma.done.wait [#allocation5], 256  }
 0x124   :  { %312 = vsyncadd [#allocation5], 4294967040 }
 0x125   :  { %239 = vsyncpa [#allocation4], 1 }
 0x126   :  { %240 = vsyncpa [#allocation7], 1 }
 0x127   :  { %241 = vsyncpa [#allocation5], 1 }

</bundles_post_ra>
